<compile_context>
chip_gen: v7x
topology: tpu7x:2x2x1
jax: 0.10.0
libtpu: 0.0.40
codegen_flags: <defaults>
</compile_context>

<pallas_src>
import functools
import math

import jax
import jax.numpy as jnp
from jax.experimental import pallas as pl
from jax.experimental.pallas import tpu as pltpu

LN_EPS = 1e-5


def _round_up(x, m):
    return ((x + m - 1) // m) * m


def _pad_last(a, target):
    pad = target - a.shape[-1]
    if pad == 0:
        return a
    return jnp.pad(a, [(0, 0)] * (a.ndim - 1) + [(0, pad)])


def _pad_mat(w, rows, cols):
    pr, pc = rows - w.shape[0], cols - w.shape[1]
    if pr == 0 and pc == 0:
        return w
    return jnp.pad(w, ((0, pr), (0, pc)))


# ---------------------------------------------------------------------------
# Kernel 1: fused LN -> Linear -> ReLU -> LN -> Linear  (video_map / query_map)
# Batched over ALL k at once (weights are shared across k).
# ---------------------------------------------------------------------------
def mlp_map_kernel(x_ref, g1_ref, b1_ref, w1_ref, bb1_ref,
                   g2_ref, b2_ref, w2_ref, bb2_ref, o_ref, *, d_in, d_mid):
    """LN -> Linear -> ReLU -> LN -> Linear on one (TN, Din_p) row tile.

    Feature axes are zero-padded to a lane multiple; d_in / d_mid are the TRUE
    widths.  Zero-padded inputs + zero-padded gamma/beta/W keep the math exact:
    the sums ignore the zero lanes and the post-LN padded lanes are forced to 0.
    Variance uses E[x^2] - E[x]^2 (two independent reductions, no lane mask).
    """
    wdt = w1_ref.dtype                      # f32, or bf16 when weights are pre-cast
    x = x_ref[...].astype(jnp.float32)      # (TN, Din_p)

    mu = jnp.sum(x, axis=-1, keepdims=True) * (1.0 / d_in)
    ex2 = jnp.sum(x * x, axis=-1, keepdims=True) * (1.0 / d_in)
    xn = (x - mu) * jax.lax.rsqrt(ex2 - mu * mu + LN_EPS)
    xn = xn * g1_ref[...] + b1_ref[...]     # padded lanes -> 0 (gamma/beta zero-padded)

    h = jnp.dot(xn.astype(wdt), w1_ref[...],
                preferred_element_type=jnp.float32) + bb1_ref[...]
    h = jnp.maximum(h, 0.0)                 # ReLU

    mu2 = jnp.sum(h, axis=-1, keepdims=True) * (1.0 / d_mid)
    ex22 = jnp.sum(h * h, axis=-1, keepdims=True) * (1.0 / d_mid)
    hn = (h - mu2) * jax.lax.rsqrt(ex22 - mu2 * mu2 + LN_EPS)
    hn = hn * g2_ref[...] + b2_ref[...]

    o = jnp.dot(hn.astype(wdt), w2_ref[...],
                preferred_element_type=jnp.float32) + bb2_ref[...]
    o_ref[...] = o.astype(o_ref.dtype)


def mlp_map(x2d, prm, *, d_pad, block_rows=512, use_bf16=False,
            out_dtype=jnp.float32):
    """Fused LN/Linear/ReLU/LN/Linear over a [N, d_in] token slab (all k batched).

    Features are zero-padded to a multiple of 128 (lane-dense stores / 128-aligned
    MXU dims); rows are padded to the tile size and sliced off afterwards.
    """
    N, d_in = x2d.shape
    d_mid = prm["w2"].shape[1]
    din_p = _round_up(d_in, 128)
    Dp = d_pad

    x2d = _pad_last(x2d, din_p)
    g1 = _pad_last(prm["g1"], din_p)
    b1 = _pad_last(prm["b1"], din_p)
    w1 = _pad_mat(prm["w1"], din_p, Dp)
    bb1 = _pad_last(prm["bb1"], Dp)
    g2 = _pad_last(prm["g2"], Dp)
    b2 = _pad_last(prm["b2"], Dp)
    w2 = _pad_mat(prm["w2"], Dp, Dp)
    bb2 = _pad_last(prm["bb2"], Dp)
    if use_bf16:
        # Pre-cast weights ONCE in the wrapper: halves weight DMA / VMEM and removes
        # the per-grid-step VPU cast.  LN / bias math stays f32.
        w1 = w1.astype(jnp.bfloat16)
        w2 = w2.astype(jnp.bfloat16)

    n8 = _round_up(N, 8)
    TN = min(block_rows, n8)
    # Aim for >=2 grid steps so both v7x TensorCores get work.
    if (n8 // TN) < 2 and n8 >= 16:
        TN = _round_up(n8 // 2, 8)
    Np = _round_up(n8, TN)
    if Np != N:
        # Padded zero rows produce finite LN output and are sliced off below.
        x2d = jnp.pad(x2d, ((0, Np - N), (0, 0)))

    kern = functools.partial(mlp_map_kernel, d_in=d_in, d_mid=d_mid)
    out = pl.pallas_call(
        kern,
        out_shape=jax.ShapeDtypeStruct((Np, Dp), out_dtype),
        grid_spec=pltpu.PrefetchScalarGridSpec(
            num_scalar_prefetch=0,
            grid=(Np // TN,),
            in_specs=[
                pl.BlockSpec((TN, din_p), lambda i: (i, 0)),
                pl.BlockSpec((1, din_p), lambda i: (0, 0)),   # gamma1
                pl.BlockSpec((1, din_p), lambda i: (0, 0)),   # beta1
                pl.BlockSpec((din_p, Dp), lambda i: (0, 0)),  # W1
                pl.BlockSpec((1, Dp), lambda i: (0, 0)),      # b1
                pl.BlockSpec((1, Dp), lambda i: (0, 0)),      # gamma2
                pl.BlockSpec((1, Dp), lambda i: (0, 0)),      # beta2
                pl.BlockSpec((Dp, Dp), lambda i: (0, 0)),     # W2
                pl.BlockSpec((1, Dp), lambda i: (0, 0)),      # b2
            ],
            out_specs=pl.BlockSpec((TN, Dp), lambda i: (i, 0)),
        ),
        compiler_params=pltpu.CompilerParams(dimension_semantics=("parallel",)),
    )(x2d, g1, b1, w1, bb1, g2, b2, w2, bb2)
    return out[:N]


# ---------------------------------------------------------------------------
# Kernel 2: attention pooling, one grid step = one (k, b) pair over ALL t slices.
#   att = softmax(q_map(q) @ v_map(v)^T / sqrt(D));  o = max_q(att @ v + q)
#   out = v[:, 0] + o * tanh(scale[k])
# ---------------------------------------------------------------------------
def attn_pool_kernel(v_ref, q_ref, wv_ref, bv_ref, wq_ref, bq_ref,
                     scale_ref, o_ref, *, d_true):
    i = pl.program_id(0)
    wdt = wv_ref.dtype                       # f32, or bf16 when weights are pre-cast

    v = v_ref[...]                           # (t, P, Dp), f32 or bf16
    q = q_ref[...].astype(jnp.float32)       # (NQ, Dp)
    t, p, dp = v.shape
    nq = q.shape[0]

    v_flat = v.reshape(t * p, dp)            # all t slices as one row slab

    # v_map / q_map linears: flat 2D MXU matmuls (no per-t weight broadcast).
    vmap = jnp.dot(v_flat.astype(wdt), wv_ref[...],
                   preferred_element_type=jnp.float32) + bv_ref[...]    # (t*p, Dp)
    qmap = jnp.dot(q.astype(wdt), wq_ref[...],
                   preferred_element_type=jnp.float32) + bq_ref[...]    # (NQ, Dp)
    qmap = qmap * (1.0 / math.sqrt(d_true))  # fold 1/sqrt(D) into the tiny operand

    # logits[t*p, NQ] = vmap @ qmap^T : one flat MXU matmul, no qmap broadcast.
    logits = jax.lax.dot_general(
        vmap.astype(wdt), qmap.astype(wdt),
        (((1,), (1,)), ((), ())), preferred_element_type=jnp.float32)   # (t*p, NQ)
    logits = jnp.swapaxes(logits.reshape(t, p, nq), 1, 2)               # (t, NQ, P)

    # Softmax over patches (lane axis); approximate reciprocal runs on the EUP.
    logits = logits - jnp.max(logits, axis=-1, keepdims=True)
    e = jnp.exp(logits)
    att = e * pl.reciprocal(jnp.sum(e, axis=-1, keepdims=True), approx=True)

    o = jnp.einsum("tqp,tpd->tqd", att.astype(wdt), v.astype(wdt),
                   preferred_element_type=jnp.float32)                  # (t, NQ, Dp)
    o = jnp.max(o + q[None], axis=1)                                    # (t, Dp)

    out = v[:, 0, :].astype(jnp.float32) + o * scale_ref[i]
    o_ref[...] = out.astype(o_ref.dtype)


def attn_pool(v_pool, q_emb, wv, bv, wq, bq, scale_rows, *, d_true):
    """v_pool: [k*b, t, P, Dp], q_emb: [k*b, NQ, Dp], scale_rows: [k*b] (tanh'ed)."""
    KB, t, P, Dp = v_pool.shape
    NQ = q_emb.shape[1]
    kern = functools.partial(attn_pool_kernel, d_true=d_true)
    return pl.pallas_call(
        kern,
        out_shape=jax.ShapeDtypeStruct((KB, t, Dp), jnp.float32),
        grid_spec=pltpu.PrefetchScalarGridSpec(
            num_scalar_prefetch=0,
            grid=(KB,),
            in_specs=[
                pl.BlockSpec((pl.Squeezed(), t, P, Dp), lambda i: (i, 0, 0, 0)),
                pl.BlockSpec((pl.Squeezed(), NQ, Dp), lambda i: (i, 0, 0)),
                pl.BlockSpec((Dp, Dp), lambda i: (0, 0)),            # v_map W
                pl.BlockSpec((1, Dp), lambda i: (0, 0)),             # v_map b
                pl.BlockSpec((Dp, Dp), lambda i: (0, 0)),            # q_map W
                pl.BlockSpec((1, Dp), lambda i: (0, 0)),             # q_map b
                pl.BlockSpec(memory_space=pltpu.MemorySpace.SMEM),   # tanh(scale) per row
            ],
            out_specs=pl.BlockSpec((pl.Squeezed(), t, Dp), lambda i: (i, 0, 0)),
        ),
        compiler_params=pltpu.CompilerParams(dimension_semantics=("parallel",)),
    )(v_pool, q_emb, wv, bv, wq, bq, scale_rows)


# ---------------------------------------------------------------------------
# Parameter init (shapes follow R2Block.__init__; deterministic synthetic init)
# ---------------------------------------------------------------------------
def init_params(key, dims, in_dims, k, use_tef=True):
    d_v = in_dims[0] + 2 if use_tef else in_dims[0]
    d_q = in_dims[1]
    ks = jax.random.split(key, 8)

    def lin(kw, fi, fo):
        return jax.random.normal(kw, (fi, fo), jnp.float32) * 0.05

    def mlp_params(k1, k2, din, d):
        return dict(
            g1=jnp.ones((1, din), jnp.float32), b1=jnp.zeros((1, din), jnp.float32),
            w1=lin(k1, din, d), bb1=jnp.zeros((1, d), jnp.float32),
            g2=jnp.ones((1, d), jnp.float32), b2=jnp.zeros((1, d), jnp.float32),
            w2=lin(k2, d, d), bb2=jnp.zeros((1, d), jnp.float32),
        )

    return dict(
        video_map=mlp_params(ks[0], ks[1], d_v, dims),
        query_map=mlp_params(ks[2], ks[3], d_q, dims),
        v_map_w=lin(ks[4], dims, dims), v_map_b=jnp.zeros((1, dims), jnp.float32),
        q_map_w=lin(ks[5], dims, dims), q_map_b=jnp.zeros((1, dims), jnp.float32),
        # nn.Parameter(torch.zeros([k-1])) / zeros([k]) -- small nonzero values so
        # the scale/gate paths are exercised.
        gate=jax.random.normal(ks[6], (k - 1,), jnp.float32) * 0.1,
        scale=jax.random.normal(ks[7], (k,), jnp.float32) * 0.1,
    )


# ---------------------------------------------------------------------------
# Forward (Pallas kernels for the hot paths, JAX glue for the rest)
# ---------------------------------------------------------------------------
def r2block_forward(params, video_emb, query_emb, video_msk, query_msk,
                    *, k, dims, use_tef=True, use_bf16=False, block_rows=512):
    video_emb = video_emb[-k:]
    query_emb = query_emb[-k:]
    _, b, t, p, _ = video_emb.shape
    nq = query_emb.shape[2]

    if use_tef:
        tef_s = jnp.arange(t, dtype=jnp.float32) / t
        tef = jnp.stack((tef_s, tef_s + 1.0 / t), axis=1)                 # [t, 2]
        tef = jnp.broadcast_to(tef[None, None, :, None, :], (k, b, t, p, 2))
        video_emb = jnp.concatenate([video_emb, tef], axis=-1)

    d_v = video_emb.shape[-1]
    Dp = _round_up(dims, 128)       # lane-dense feature width for all kernel I/O
    v_dtype = jnp.bfloat16 if use_bf16 else jnp.float32

    # One batched mlp_map per stream (weights shared across k).  The big video slab
    # is emitted in bf16 when use_bf16 (it is re-read by attn_pool).
    v_all = mlp_map(video_emb.reshape(k * b * t * p, d_v), params["video_map"],
                    d_pad=Dp, block_rows=block_rows, use_bf16=use_bf16,
                    out_dtype=v_dtype)
    v_all = v_all.reshape(k, b, t, p, Dp)
    q_all = mlp_map(query_emb.reshape(k * b * nq, query_emb.shape[-1]),
                    params["query_map"], d_pad=Dp, block_rows=block_rows,
                    use_bf16=use_bf16, out_dtype=jnp.float32)
    q_all = q_all.reshape(k, b, nq, Dp)

    wv = _pad_mat(params["v_map_w"], Dp, Dp)
    bv = _pad_last(params["v_map_b"], Dp)
    wq = _pad_mat(params["q_map_w"], Dp, Dp)
    bq = _pad_last(params["q_map_b"], Dp)
    if use_bf16:
        wv = wv.astype(jnp.bfloat16)
        wq = wq.astype(jnp.bfloat16)

    # One batched attention-pool call over all (k, b); rows are k-major, b-minor
    # (must match the v_all.reshape(k*b, ...) ordering below).
    scale_rows = jnp.repeat(jnp.tanh(params["scale"]).astype(jnp.float32), b)
    o_all = attn_pool(v_all.reshape(k * b, t, p, Dp),
                      q_all.reshape(k * b, nq, Dp),
                      wv, bv, wq, bq, scale_rows, d_true=dims)            # [k*b, t, Dp]
    o_all = o_all.reshape(k, b, t, Dp)

    # Only the tiny (k-1)-step gate recurrence stays sequential in JAX.
    coll_v, coll_q, last = [], [], None
    for i in range(k - 1, -1, -1):
        coll_v.append(v_all[i][:, :, 0, :dims])
        coll_q.append(q_all[i][..., :dims])
        v_new = o_all[i]
        if i < k - 1:
            gate = jax.nn.sigmoid(params["gate"][i])
            v_new = gate * v_new + (1.0 - gate) * last
        # TODO(synk): self.pos / self.tem (build_model(pos_cfg/tem_cfg)) are
        # unspecified external modules; treated as identity: last = v_new.
        last = v_new

    return last[..., :dims], q_all[0][..., :dims], coll_v, coll_q


# ---------------------------------------------------------------------------
# Pure-JAX reference (for correctness check only)
# ---------------------------------------------------------------------------
def _ln(x, g, b):
    mu = jnp.mean(x, -1, keepdims=True)
    var = jnp.mean((x - mu) ** 2, -1, keepdims=True)
    return (x - mu) * jax.lax.rsqrt(var + LN_EPS) * g + b


def _mlp_ref(x, prm):
    h = jnp.maximum(_ln(x, prm["g1"], prm["b1"]) @ prm["w1"] + prm["bb1"], 0.0)
    return _ln(h, prm["g2"], prm["b2"]) @ prm["w2"] + prm["bb2"]


def r2block_ref(params, video_emb, query_emb, *, k, dims, use_tef=True):
    video_emb = video_emb[-k:]
    query_emb = query_emb[-k:]
    _, b, t, p, _ = video_emb.shape
    if use_tef:
        tef_s = jnp.arange(t, dtype=jnp.float32) / t
        tef = jnp.stack((tef_s, tef_s + 1.0 / t), axis=1)
        tef = jnp.broadcast_to(tef[None, None, :, None, :], (k, b, t, p, 2))
        video_emb = jnp.concatenate([video_emb, tef], axis=-1)
    last, q_emb = None, None
    for i in range(k - 1, -1, -1):
        v_emb = _mlp_ref(video_emb[i], params["video_map"])      # [b,t,p,D]
        q_emb = _mlp_ref(query_emb[i], params["query_map"])      # [b,nq,D]
        v_pool = v_emb.reshape(b * t, p, dims)
        q_pool = jnp.repeat(q_emb, t, axis=0)                    # [b*t,nq,D]
        vm = v_pool @ params["v_map_w"] + params["v_map_b"]
        qm = q_pool @ params["q_map_w"] + params["q_map_b"]
        att = jax.nn.softmax(
            jnp.einsum("bqd,bpd->bqp", qm, vm) / math.sqrt(dims), axis=-1)
        o_pool = jnp.einsum("bqp,bpd->bqd", att, v_pool) + q_pool
        o_pool = jnp.max(o_pool, axis=1, keepdims=True)
        v_new = (v_pool[:, 0:1] + o_pool * jnp.tanh(params["scale"][i]))
        v_new = v_new.reshape(b, t, dims)
        if i < k - 1:
            g = jax.nn.sigmoid(params["gate"][i])
            v_new = g * v_new + (1 - g) * last
        last = v_new
    return last, q_emb


# ---------------------------------------------------------------------------
if __name__ == "__main__":
    k, dims = 4, 32
    in_dims = (30, 24)
    b, t, p, nq = 2, 4, 3, 5

    key = jax.random.PRNGKey(0)
    k_v, k_q, k_p = jax.random.split(key, 3)
    video_emb = jax.random.normal(k_v, (k, b, t, p, in_dims[0]), jnp.float32)
    query_emb = jax.random.normal(k_q, (k, b, nq, in_dims[1]), jnp.float32)
    video_msk = jnp.ones((b, t), jnp.float32)
    query_msk = jnp.ones((b, nq), jnp.float32)

    params = init_params(k_p, dims, in_dims, k, use_tef=True)

    # f32 MXU path (tight check; tolerance covers the EUP approx-reciprocal softmax
    # and the E[x^2]-E[x]^2 LayerNorm variance form).
    last, q_out, coll_v, coll_q = r2block_forward(
        params, video_emb, query_emb, video_msk, query_msk,
        k=k, dims=dims, use_tef=True, use_bf16=False)
    jax.block_until_ready(last)
    jax.block_until_ready(q_out)

    last_ref, q_ref = r2block_ref(params, video_emb, query_emb,
                                  k=k, dims=dims, use_tef=True)
    assert last.shape == (b, t, dims) and q_out.shape == (b, nq, dims)
    assert len(coll_v) == k and len(coll_q) == k
    assert jnp.allclose(last, last_ref, rtol=5e-3, atol=5e-3)
    assert jnp.allclose(q_out, q_ref, rtol=5e-3, atol=5e-3)

    # bf16-at-the-MXU path (v6e/v7x recommendation): run + loose sanity check.
    last_bf, q_bf, _, _ = r2block_forward(
        params, video_emb, query_emb, video_msk, query_msk,
        k=k, dims=dims, use_tef=True, use_bf16=True)
    jax.block_until_ready(last_bf)
    assert last_bf.shape == (b, t, dims)
    assert bool(jnp.all(jnp.isfinite(last_bf)))
    assert jnp.allclose(last_bf, last_ref, rtol=1e-1, atol=1e-1)

    print("KERNEL_OK")
</pallas_src>

<mosaic_0001>
module attributes {stable_mosaic.version = 11 : i64} {
  func.func @mlp_map_kernel(%arg0: i32, %arg1: memref<48x128xf32, #tpu.memory_space<vmem>>, %arg2: memref<1x128xf32, #tpu.memory_space<vmem>>, %arg3: memref<1x128xf32, #tpu.memory_space<vmem>>, %arg4: memref<128x128xf32, #tpu.memory_space<vmem>>, %arg5: memref<1x128xf32, #tpu.memory_space<vmem>>, %arg6: memref<1x128xf32, #tpu.memory_space<vmem>>, %arg7: memref<1x128xf32, #tpu.memory_space<vmem>>, %arg8: memref<128x128xf32, #tpu.memory_space<vmem>>, %arg9: memref<1x128xf32, #tpu.memory_space<vmem>>, %arg10: memref<48x128xf32, #tpu.memory_space<vmem>>) attributes {dimension_semantics = [#tpu.dimension_semantics<parallel>], iteration_bounds = array<i64: 2>, scalar_prefetch = 0 : i64, scratch_operands = 0 : i64, tpu.core_type = #tpu.core_type<tc>, window_params = [{transform_indices = @transform_0, window_bounds = array<i64: 48, 128>}, {pipeline_mode = #tpu.pipeline_mode<synchronous>, transform_indices = @transform_1, window_bounds = array<i64: 1, 128>}, {pipeline_mode = #tpu.pipeline_mode<synchronous>, transform_indices = @transform_2, window_bounds = array<i64: 1, 128>}, {pipeline_mode = #tpu.pipeline_mode<synchronous>, transform_indices = @transform_3, window_bounds = array<i64: 128, 128>}, {pipeline_mode = #tpu.pipeline_mode<synchronous>, transform_indices = @transform_4, window_bounds = array<i64: 1, 128>}, {pipeline_mode = #tpu.pipeline_mode<synchronous>, transform_indices = @transform_5, window_bounds = array<i64: 1, 128>}, {pipeline_mode = #tpu.pipeline_mode<synchronous>, transform_indices = @transform_6, window_bounds = array<i64: 1, 128>}, {pipeline_mode = #tpu.pipeline_mode<synchronous>, transform_indices = @transform_7, window_bounds = array<i64: 128, 128>}, {pipeline_mode = #tpu.pipeline_mode<synchronous>, transform_indices = @transform_8, window_bounds = array<i64: 1, 128>}, {transform_indices = @transform_9, window_bounds = array<i64: 48, 128>}]} {
    %c0 = arith.constant 0 : index
    %c0_0 = arith.constant 0 : index
    %0 = vector.load %arg1[%c0, %c0_0] : memref<48x128xf32, #tpu.memory_space<vmem>>, vector<48x128xf32>
    %cst = arith.constant dense<0.000000e+00> : vector<48xf32>
    %1 = vector.multi_reduction <add>, %0, %cst [1] : vector<48x128xf32> to vector<48xf32>
    %2 = vector.shape_cast %1 : vector<48xf32> to vector<48x1xf32>
    %cst_1 = arith.constant 3.125000e-02 : f32
    %3 = vector.broadcast %cst_1 : f32 to vector<48x1xf32>
    %4 = arith.mulf %2, %3 : vector<48x1xf32>
    %5 = arith.mulf %0, %0 : vector<48x128xf32>
    %cst_2 = arith.constant dense<0.000000e+00> : vector<48xf32>
    %6 = vector.multi_reduction <add>, %5, %cst_2 [1] : vector<48x128xf32> to vector<48xf32>
    %7 = vector.shape_cast %6 : vector<48xf32> to vector<48x1xf32>
    %cst_3 = arith.constant 3.125000e-02 : f32
    %8 = vector.broadcast %cst_3 : f32 to vector<48x1xf32>
    %9 = arith.mulf %7, %8 : vector<48x1xf32>
    %10 = vector.broadcast %4 : vector<48x1xf32> to vector<48x128xf32>
    %11 = arith.subf %0, %10 : vector<48x128xf32>
    %12 = arith.mulf %4, %4 : vector<48x1xf32>
    %13 = arith.subf %9, %12 : vector<48x1xf32>
    %cst_4 = arith.constant 9.99999974E-6 : f32
    %14 = vector.broadcast %cst_4 : f32 to vector<48x1xf32>
    %15 = arith.addf %13, %14 : vector<48x1xf32>
    %16 = math.rsqrt %15 : vector<48x1xf32>
    %17 = vector.broadcast %16 : vector<48x1xf32> to vector<48x128xf32>
    %18 = arith.mulf %11, %17 : vector<48x128xf32>
    %c0_5 = arith.constant 0 : index
    %c0_6 = arith.constant 0 : index
    %19 = vector.load %arg2[%c0_5, %c0_6] : memref<1x128xf32, #tpu.memory_space<vmem>>, vector<1x128xf32>
    %20 = vector.broadcast %19 : vector<1x128xf32> to vector<48x128xf32>
    %21 = arith.mulf %18, %20 : vector<48x128xf32>
    %c0_7 = arith.constant 0 : index
    %c0_8 = arith.constant 0 : index
    %22 = vector.load %arg3[%c0_7, %c0_8] : memref<1x128xf32, #tpu.memory_space<vmem>>, vector<1x128xf32>
    %23 = vector.broadcast %22 : vector<1x128xf32> to vector<48x128xf32>
    %24 = arith.addf %21, %23 : vector<48x128xf32>
    %c0_9 = arith.constant 0 : index
    %c0_10 = arith.constant 0 : index
    %25 = vector.load %arg4[%c0_9, %c0_10] : memref<128x128xf32, #tpu.memory_space<vmem>>, vector<128x128xf32>
    %cst_11 = arith.constant dense<0.000000e+00> : vector<48x128xf32>
    %26 = tpu.matmul %24, %25, %cst_11 {dimension_numbers = #tpu.dot_dimension_numbers<[1], [0], [0], [1], [0, 0, 1, 1], [], []>} : vector<48x128xf32>, vector<128x128xf32>, vector<48x128xf32> -> vector<48x128xf32>
    %c0_12 = arith.constant 0 : index
    %c0_13 = arith.constant 0 : index
    %27 = vector.load %arg5[%c0_12, %c0_13] : memref<1x128xf32, #tpu.memory_space<vmem>>, vector<1x128xf32>
    %28 = vector.broadcast %27 : vector<1x128xf32> to vector<48x128xf32>
    %29 = arith.addf %26, %28 : vector<48x128xf32>
    %cst_14 = arith.constant 0.000000e+00 : f32
    %30 = vector.broadcast %cst_14 : f32 to vector<48x128xf32>
    %31 = arith.maximumf %29, %30 : vector<48x128xf32>
    %cst_15 = arith.constant dense<0.000000e+00> : vector<48xf32>
    %32 = vector.multi_reduction <add>, %31, %cst_15 [1] : vector<48x128xf32> to vector<48xf32>
    %33 = vector.shape_cast %32 : vector<48xf32> to vector<48x1xf32>
    %cst_16 = arith.constant 3.125000e-02 : f32
    %34 = vector.broadcast %cst_16 : f32 to vector<48x1xf32>
    %35 = arith.mulf %33, %34 : vector<48x1xf32>
    %36 = arith.mulf %31, %31 : vector<48x128xf32>
    %cst_17 = arith.constant dense<0.000000e+00> : vector<48xf32>
    %37 = vector.multi_reduction <add>, %36, %cst_17 [1] : vector<48x128xf32> to vector<48xf32>
    %38 = vector.shape_cast %37 : vector<48xf32> to vector<48x1xf32>
    %cst_18 = arith.constant 3.125000e-02 : f32
    %39 = vector.broadcast %cst_18 : f32 to vector<48x1xf32>
    %40 = arith.mulf %38, %39 : vector<48x1xf32>
    %41 = vector.broadcast %35 : vector<48x1xf32> to vector<48x128xf32>
    %42 = arith.subf %31, %41 : vector<48x128xf32>
    %43 = arith.mulf %35, %35 : vector<48x1xf32>
    %44 = arith.subf %40, %43 : vector<48x1xf32>
    %cst_19 = arith.constant 9.99999974E-6 : f32
    %45 = vector.broadcast %cst_19 : f32 to vector<48x1xf32>
    %46 = arith.addf %44, %45 : vector<48x1xf32>
    %47 = math.rsqrt %46 : vector<48x1xf32>
    %48 = vector.broadcast %47 : vector<48x1xf32> to vector<48x128xf32>
    %49 = arith.mulf %42, %48 : vector<48x128xf32>
    %c0_20 = arith.constant 0 : index
    %c0_21 = arith.constant 0 : index
    %50 = vector.load %arg6[%c0_20, %c0_21] : memref<1x128xf32, #tpu.memory_space<vmem>>, vector<1x128xf32>
    %51 = vector.broadcast %50 : vector<1x128xf32> to vector<48x128xf32>
    %52 = arith.mulf %49, %51 : vector<48x128xf32>
    %c0_22 = arith.constant 0 : index
    %c0_23 = arith.constant 0 : index
    %53 = vector.load %arg7[%c0_22, %c0_23] : memref<1x128xf32, #tpu.memory_space<vmem>>, vector<1x128xf32>
    %54 = vector.broadcast %53 : vector<1x128xf32> to vector<48x128xf32>
    %55 = arith.addf %52, %54 : vector<48x128xf32>
    %c0_24 = arith.constant 0 : index
    %c0_25 = arith.constant 0 : index
    %56 = vector.load %arg8[%c0_24, %c0_25] : memref<128x128xf32, #tpu.memory_space<vmem>>, vector<128x128xf32>
    %cst_26 = arith.constant dense<0.000000e+00> : vector<48x128xf32>
    %57 = tpu.matmul %55, %56, %cst_26 {dimension_numbers = #tpu.dot_dimension_numbers<[1], [0], [0], [1], [0, 0, 1, 1], [], []>} : vector<48x128xf32>, vector<128x128xf32>, vector<48x128xf32> -> vector<48x128xf32>
    %c0_27 = arith.constant 0 : index
    %c0_28 = arith.constant 0 : index
    %58 = vector.load %arg9[%c0_27, %c0_28] : memref<1x128xf32, #tpu.memory_space<vmem>>, vector<1x128xf32>
    %59 = vector.broadcast %58 : vector<1x128xf32> to vector<48x128xf32>
    %60 = arith.addf %57, %59 : vector<48x128xf32>
    %c0_29 = arith.constant 0 : index
    %c0_30 = arith.constant 0 : index
    %61 = vector.load %arg10[%c0_29, %c0_30] : memref<48x128xf32, #tpu.memory_space<vmem>>, vector<48x128xf32>
    tpu.vector_store %arg10[%c0_29, %c0_30], %60 {strides = array<i32>} : memref<48x128xf32, #tpu.memory_space<vmem>>, vector<48x128xf32>,
    return
  }
  func.func @transform_0(%arg0: i32) -> (i32, i32) {
    %c0_i32 = arith.constant 0 : i32
    %c0_i32_0 = arith.constant 0 : i32
    return %arg0, %c0_i32 : i32, i32
  }
  func.func @transform_1(%arg0: i32) -> (i32, i32) {
    %c0_i32 = arith.constant 0 : i32
    %c0_i32_0 = arith.constant 0 : i32
    %c0_i32_1 = arith.constant 0 : i32
    return %c0_i32, %c0_i32_0 : i32, i32
  }
  func.func @transform_2(%arg0: i32) -> (i32, i32) {
    %c0_i32 = arith.constant 0 : i32
    %c0_i32_0 = arith.constant 0 : i32
    %c0_i32_1 = arith.constant 0 : i32
    return %c0_i32, %c0_i32_0 : i32, i32
  }
  func.func @transform_3(%arg0: i32) -> (i32, i32) {
    %c0_i32 = arith.constant 0 : i32
    %c0_i32_0 = arith.constant 0 : i32
    %c0_i32_1 = arith.constant 0 : i32
    return %c0_i32, %c0_i32_0 : i32, i32
  }
  func.func @transform_4(%arg0: i32) -> (i32, i32) {
    %c0_i32 = arith.constant 0 : i32
    %c0_i32_0 = arith.constant 0 : i32
    %c0_i32_1 = arith.constant 0 : i32
    return %c0_i32, %c0_i32_0 : i32, i32
  }
  func.func @transform_5(%arg0: i32) -> (i32, i32) {
    %c0_i32 = arith.constant 0 : i32
    %c0_i32_0 = arith.constant 0 : i32
    %c0_i32_1 = arith.constant 0 : i32
    return %c0_i32, %c0_i32_0 : i32, i32
  }
  func.func @transform_6(%arg0: i32) -> (i32, i32) {
    %c0_i32 = arith.constant 0 : i32
    %c0_i32_0 = arith.constant 0 : i32
    %c0_i32_1 = arith.constant 0 : i32
    return %c0_i32, %c0_i32_0 : i32, i32
  }
  func.func @transform_7(%arg0: i32) -> (i32, i32) {
    %c0_i32 = arith.constant 0 : i32
    %c0_i32_0 = arith.constant 0 : i32
    %c0_i32_1 = arith.constant 0 : i32
    return %c0_i32, %c0_i32_0 : i32, i32
  }
  func.func @transform_8(%arg0: i32) -> (i32, i32) {
    %c0_i32 = arith.constant 0 : i32
    %c0_i32_0 = arith.constant 0 : i32
    %c0_i32_1 = arith.constant 0 : i32
    return %c0_i32, %c0_i32_0 : i32, i32
  }
  func.func @transform_9(%arg0: i32) -> (i32, i32) {
    %c0_i32 = arith.constant 0 : i32
    %c0_i32_0 = arith.constant 0 : i32
    return %arg0, %c0_i32 : i32, i32
  }
}

</mosaic_0001>

<bundles_post_ra>
// kernel: tpu_custom_call.1
= control target key start
LH: loop header
LB: loop body
LE: loop exit
PB: predicated region body
PF: predicated region fallthrough
CT: control target
= control target key end

     0   :  { %s1810_s0 = inlined_call_operand.hbm [shape: f32[96,128], index: 0, kind: input, shape index: {}]   ;;  %s1811_s1 = inlined_call_operand.vmem [shape: f32[1,128], index: 1, kind: input, shape index: {}]   ;;  %s1812_s2 = inlined_call_operand.vmem [shape: f32[1,128], index: 2, kind: input, shape index: {}]   ;;  %s1813_s3 = inlined_call_operand.hbm [shape: f32[128,128], index: 3, kind: input, shape index: {}]   ;;  %s1814_s4 = inlined_call_operand.vmem [shape: f32[1,128], index: 4, kind: input, shape index: {}]   ;;  %s1815_s5 = inlined_call_operand.vmem [shape: f32[1,128], index: 5, kind: input, shape index: {}]   ;;  %s1816_s6 = inlined_call_operand.vmem [shape: f32[1,128], index: 6, kind: input, shape index: {}]   ;;  %s1817_s7 = inlined_call_operand.hbm [shape: f32[128,128], index: 7, kind: input, shape index: {}]   ;;  %s1818_s8 = inlined_call_operand.vmem [shape: f32[1,128], index: 8, kind: input, shape index: {}]   ;;  %s1819_s9 = inlined_call_operand.hbm [shape: f32[96,128], index: 9, kind: output, shape index: {}]  }
   0x1   :  { %1826 = sst [smem:[#allocation13_spill]] %s1813_s3 }
   0x2   :  { %1827 = sst [smem:[#allocation14_spill]] %s1817_s7 }
   0x3   :  { %14 = vsyncpa [#allocation3], 0 }
   0x4   :  { %16 = vsyncpa [#allocation3 + $0x1], 0 }
   0x5   :  { %17 = vsyncpa [#allocation6], 0 }
   0x6   :  { %18 = vsyncpa [#allocation4], 0 }
   0x7   :  { %20 = vsyncpa [#allocation4 + $0x1], 0  ;;  %s1473_s30 = smov 0   ;;  %s1475_s10 = smov 0  }
   0x8   :  { %s1477_s11 = smov 0   ;;  %s1479_s12 = smov 0  }
   0x9 LB: > { %s1494_s13 = sadd.s32 4294967295, %s1413_s12   ;;  %s950_s14 = sadd.s32 4294967294, %s1413_s12   ;;  %s1413_s12 = sphi %s1479_s12, %s1850_s12   ;;  %s1409_s11 = sphi %s1477_s11, %s1849_s11   ;;  %s1405_s10 = sphi %s1475_s10, %s1848_s10   ;;  %s1401_s30 = sphi %s1473_s30, %s1847_s30  }
   0xa   : > { %p46_p0 = scmp.ne.s32.totalorder %s1405_s10, %s1401_s30  ;;  %p1820_p1 = scmp.eq.s32.totalorder %s1494_s13, 0 }
   0xb   : > { %p244_p3 = scmp.eq.s32.totalorder %s950_s14, 1  ;;  %p951_p5 = scmp.ge.s32.totalorder %s1413_s12, 1 }
   0xc   : > { %p1503_p4 = por %p1820_p1, %p46_p0  ;;  %p251_p7 = scmp.lt.s32.totalorder %s1413_s12, 3 }
   0xd   : > { %p1508_p6 = por %p244_p3, %p46_p0  ;;  %s1415_s18 = smov [#allocation5]  }
   0xe   : > { %s1828_s15 = scalar_select %p1503_p4, 1, 0 }
   0xf   : > { %s1829_s16 = scalar_select %p1508_p6, 1, 0 }
  0x10   : > { %p1513_p8 = pnand %p951_p5, %p251_p7  ;;  %s269_s19 = sshll.u32 %s1415_s18, 4  ;;  %s1517_s19 = int_to_ptr.vmem [resolvable:$true] %s269_s19 }
  0x11   : > { %1830 = sst [smem:[#allocation12_spill]] %s1829_s16  ;;  %s1416_s21 = smov [#allocation7]  }
  0x12   : > { %p1174_p9 = pneg %p1513_p8  ;;  %s291_s22 = sshll.u32 %s1416_s21, 4  ;;  %s1528_s22 = int_to_ptr.vmem [resolvable:$true] %s291_s22 }
  0x13   : > { %s1833_s3 = sld [smem:[#allocation13_spill]] }
  0x14   : > { %p1524_p11 = pnand %p1174_p9, %p1820_p1 }
  0x16   : > { %p1259_p13 = pneg %p1524_p11 }
  0x19   : > { %s1257_s25 = scalar_lea.hbm %s1833_s3, 2048 }
  0x1a   : > { %p1258_p12 = scmp.ne.s32.totalorder %s1833_s3, %s1257_s25  ;;  %p1264_p5 = scmp.lt.u32.totalorder %s1257_s25, %s1833_s3 }
  0x1c   : > { %p1260_p0 = pnand %p1259_p13, %p1258_p12 }
  0x1e   : > { %p1261_p3 = pneg %p1260_p0 }
  0x20   : > { %p1266_p7 = pnand %p1264_p5, %p1261_p3 }
  0x22   : > { %1269 = shalt.err (!%p1266_p7)
}
  0x23   : > { %s1270_s14 = scalar_lea.vmem %s1517_s19, 2048  ;;  %p1278_p2 = scmp.lt.s32.totalorder %s1517_s19, %s1517_s19 }
  0x24   : > { %p1271_p9 = scmp.ne.s32.totalorder %s1517_s19, %s1270_s14  ;;  %p1279_p12 = scmp.lt.s32.totalorder %s1270_s14, %s1270_s14 }
  0x26   : > { %p1273_p10 = pnand %p1271_p9, %p1259_p13  ;;  %p1280_p0 = por %p1279_p12, %p1278_p2 }
  0x28   : > { %p1274_p1 = pneg %p1273_p10 }
  0x2a   : > { %p1281_p6 = pnand %p1280_p0, %p1274_p1 }
  0x2c   : > { %1284 = shalt.err (!%p1281_p6)
}
  0x2d   : > { %s1822_s18 = smov 128   ;;  %s1823_s21 = smov 8  }
  0x2e   : > { %1177 = dma.hbm_to_vmem [thread:$0]  (!%p1524_p11), %s1833_s3, 2048, %s1517_s19, [#allocation6], %s1822_s18, %s1822_s18, %s1823_s21  }
  0x2f   : > { %s1834_s7 = sld [smem:[#allocation14_spill]] }
  0x35   : > { %s1285_s27 = scalar_lea.hbm %s1834_s7, 2048 }
  0x36   : > { %p1286_p1 = scmp.ne.s32.totalorder %s1834_s7, %s1285_s27  ;;  %p1292_p10 = scmp.lt.u32.totalorder %s1285_s27, %s1834_s7 }
  0x38   : > { %p1288_p2 = pnand %p1286_p1, %p1259_p13 }
  0x3a   : > { %p1289_p6 = pneg %p1288_p2 }
  0x3c   : > { %p1294_p3 = pnand %p1292_p10, %p1289_p6 }
  0x3e   : > { %1297 = shalt.err (!%p1294_p3)
}
  0x3f   : > { %s1298_s19 = scalar_lea.vmem %s1528_s22, 2048  ;;  %p1306_p12 = scmp.lt.s32.totalorder %s1528_s22, %s1528_s22 }
  0x40   : > { %p1299_p5 = scmp.ne.s32.totalorder %s1528_s22, %s1298_s19  ;;  %p1307_p0 = scmp.lt.s32.totalorder %s1298_s19, %s1298_s19 }
  0x42   : > { %p1301_p7 = pnand %p1299_p5, %p1259_p13  ;;  %p1308_p1 = por %p1307_p0, %p1306_p12 }
  0x44   : > { %p1302_p9 = pneg %p1301_p7 }
  0x46   : > { %p1309_p2 = pnand %p1308_p1, %p1302_p9 }
  0x48   : > { %1312 = shalt.err (!%p1309_p2)
}
  0x49   : > { %1180 = dma.hbm_to_vmem [thread:$0]  (!%p1524_p11), %s1834_s7, 2048, %s1528_s22, [#allocation6], %s1822_s18, %s1822_s18, %s1823_s21  }
  0x4a   : > { %s1589_s20 = sadd.s32 1, %s1413_s12   ;;  %s33_s24 = sadd.s32 1, %s1409_s11 }
  0x4b   : > { %s30_s25 = ssub.s32 %s1413_s12, %s1589_s20  ;;  %p40_p13 = scmp.ne.s32.totalorder %s1409_s11, %s1405_s10 }
  0x4c   : > { %p31_p6 = scmp.eq.s32.totalorder %s30_s25, 0  ;;  %p41_p10 = scmp.eq.s32.totalorder %s1413_s12, 0 }
  0x4d   : > { %p1835_p3 = scmp.eq.s32.totalorder %s1494_s13, 1  ;;  %p1191_p7 = scmp.lt.s32.totalorder %s1413_s12, 2 }
  0x4e   : > { %s1605_s27 = scalar_select %p31_p6, %s1409_s11, %s33_s24  }
  0x4f   : > { %p1599_p5 = por %p1835_p3, %p40_p13  ;;  %p42_p9 = por %p41_p10, %p40_p13 }
  0x50   : > { %s308_s28 = sand.u32 1, %s1409_s11   ;;  %s968_s22 = smul.u32 768, %s1413_s12 }
  0x51   : > { %s1836_s26 = scalar_select %p1599_p5, 1, 0 }
  0x52   : > { %s1160_s29 = smul.u32 48, %s308_s28  ;;  %p1609_p11 = pnand %p1191_p7, %p42_p9 }
  0x53   : > { %s1616_s23 = scalar_lea.hbm %s1810_s0, %s968_s22  ;;  %s1620_s18 = scalar_lea.sflag [#allocation3], %s308_s28 }
  0x54   : > { %s312_s24 = scalar_lea.vmem [#allocation2], %s1160_s29  ;;  %s1313_s21 = scalar_lea.hbm %s1616_s23, 768 }
  0x55   : > { %s319_s25 = sshll.u32 %s312_s24, 4  ;;  %p1314_p12 = scmp.ne.s32.totalorder %s1616_s23, %s1313_s21  ;;  %s1618_s25 = int_to_ptr.vmem [resolvable:$true] %s319_s25 }
  0x56   : > { %p1315_p0 = pneg %p1609_p11  ;;  %s1318_s16 = scalar_lea.hbm %s1810_s0, 1536 }
  0x57   : > { %p1319_p13 = scmp.lt.u32.totalorder %s1616_s23, %s1810_s0  ;;  %p1320_p6 = scmp.lt.u32.totalorder %s1318_s16, %s1313_s21 }
  0x58   : > { %p1316_p1 = pnand %p1315_p0, %p1314_p12  ;;  %p1322_p3 = scmp.lt.u32.totalorder %s1313_s21, %s1616_s23 }
  0x59   : > { %p1321_p10 = por %p1320_p6, %p1319_p13 }
  0x5a   : > { %p1317_p2 = pneg %p1316_p1 }
  0x5b   : > { %p1323_p7 = por %p1322_p3, %p1321_p10 }
  0x5d   : > { %p1324_p9 = pnand %p1323_p7, %p1317_p2 }
  0x5f   : > { %1327 = shalt.err (!%p1324_p9)
}
  0x60   : > { %s1328_s28 = scalar_lea.vmem %s1618_s25, 768  ;;  %s1419_s29 = smov [#allocation2]  }
  0x61   : > { %p1329_p12 = scmp.ne.s32.totalorder %s1618_s25, %s1328_s28  ;;  %s1333_s24 = sshll.u32 %s1419_s29, 4  ;;  %s1334_s24 = int_to_ptr.vmem [resolvable:$false] %s1333_s24 }
  0x62   : > { %s1335_s3 = scalar_lea.vmem %s1334_s24, 1536  ;;  %p1336_p4 = scmp.lt.s32.totalorder %s1618_s25, %s1334_s24 }
  0x63   : > { %p1331_p1 = pnand %p1329_p12, %p1315_p0  ;;  %p1337_p13 = scmp.lt.s32.totalorder %s1335_s3, %s1328_s28 }
  0x65   : > { %p1332_p5 = pneg %p1331_p1  ;;  %p1338_p6 = por %p1337_p13, %p1336_p4 }
  0x67   : > { %p1339_p10 = pnand %p1338_p6, %p1332_p5 }
  0x69   : > { %1342 = shalt.err (!%p1339_p10)
}
  0x6a   : > { %s1838_s7 = smov 8   ;;  %s1839_s21 = smov 128  }
  0x6b   : > { %1184 = dma.hbm_to_vmem [thread:$0]  (!%p1609_p11), %s1616_s23, 768, %s1618_s25, %s1620_s18, %s1839_s21, %s1839_s21, %s1838_s7  }
  0x6c   : > { %331 = sbr.rel (%p1513_p8) target bundleno = 926 (0x39e), region = 56  ;;  %s1654_s22 = sand.u32 (!%p1513_p8), 1, %s1405_s10  }
  0x6d   : > { %s1161_s19 = smul.u32 (!%p1513_p8), 48, %s1654_s22  ;;  %s334_s16 = scalar_lea.sflag (!%p1513_p8), [#allocation3], %s1654_s22 }
  0x6e   : > { %p1840_p4 = scmp.ne.s32.totalorder (!%p1513_p8), %s1828_s15, 0 }
  0x6f   : > { %s337_s14 = scalar_lea.vmem (!%p1513_p8), [#allocation2], %s1161_s19 }
  0x73   : > { %1388 = dma.done.wait (%p1840_p4), %s334_s16, 768  }
  0x74   : > { %1390 = vsyncadd (%p1840_p4), %s334_s16, 4294966528  ;;  %p1841_p5 = scmp.eq.s32.totalorder %s1494_s13, 0 }
  0x76   : > { %1392 = dma.done.wait (%p1841_p5), [#allocation6], 4096   ;;  %p1842_p8 = pmov %p1841_p5 }
  0x77   : > { %v1668_v0 = vld [vmem:[%s337_s14 + $0x18] sm:$0xff]  ;;  %v1670_v1 = vld [vmem:[%s337_s14] sm:$0xff]  ;;  %v1676_v3 = vld [vmem:[%s337_s14 + $0x8] sm:$0xff]  ;;  %s969_s17 = smul.u32 768, %s1494_s13  ;;  %s845_s25 = scalar_lea.sflag [#allocation4], %s1654_s22 }
  0x78   : > { %1394 = vsyncadd (%p1842_p8), [#allocation6], 4294963200  ;;  %394 = vadd.xlane.f32.xlu1 %v1668_v0  ;;  %388 = vadd.xlane.f32.xlu0 %v1670_v1  ;;  %v406_v2 = vmul.f32 %v1670_v1, %v1670_v1  ;;  %v492_v4 = vld [vmem:[#allocation5] sm:$0xff]  ;;  %v493_v5 = vld [vmem:[#allocation5 + $0x8] sm:$0xff]  ;;  %v407_v7 = vmul.f32 %v1676_v3, %v1676_v3  ;;  %v409_v10 = vmul.f32 %v1668_v0, %v1668_v0  ;;  %p1843_p0 = scmp.ne.s32.totalorder %s1836_s26, 0  ;;  %s1420_s13 = smov [#allocation8]  }
  0x79   : > { %v1096_v6 = vpack.c.bf16 %v493_v5, %v492_v4  ;;  %v1681_v8 = vld [vmem:[%s337_s14 + $0x10] sm:$0xff]  ;;  %v1688_v11 = vld [vmem:[%s337_s14 + $0x20] sm:$0xff]  ;;  %v1690_v12 = vld [vmem:[%s337_s14 + $0x28] sm:$0xff]  ;;  %s379_s14 = scalar_lea.vmem [#allocation8], %s1161_s19  ;;  %s1766_s23 = scalar_lea.hbm %s1819_s9, %s969_s17 }
  0x7a   : > { %v408_v9 = vmul.f32 %v1681_v8, %v1681_v8  ;;  %v494_v13 = vld [vmem:[#allocation5 + $0x10] sm:$0xff]  ;;  %v495_v14 = vld [vmem:[#allocation5 + $0x18] sm:$0xff]  ;;  %v410_v16 = vmul.f32 %v1688_v11, %v1688_v11  ;;  %v411_v17 = vmul.f32 %v1690_v12, %v1690_v12  ;;  %v496_v18 = vld [vmem:[#allocation5 + $0x20] sm:$0xff]  ;;  %s858_s15 = sshll.u32 %s379_s14, 4  ;;  %s1347_s29 = sshll.u32 %s1420_s13, 4  ;;  %s1761_s15 = int_to_ptr.vmem [resolvable:$true] %s858_s15  ;;  %s1348_s29 = int_to_ptr.vmem [resolvable:$false] %s1347_s29 }
  0x7b   : > { %1097 = vmatprep.subr.bf16.mxu0 %v1096_v6  ;;  %v1100_v15 = vpack.c.bf16 %v495_v14, %v494_v13  ;;  %v497_v19 = vld [vmem:[#allocation5 + $0x28] sm:$0xff]  ;;  %v498_v21 = vld [vmem:[#allocation5 + $0x30] sm:$0xff]  ;;  %v499_v22 = vld [vmem:[#allocation5 + $0x38] sm:$0xff]  ;;  %s1343_s28 = scalar_lea.vmem %s1761_s15, 768  ;;  %s1349_s24 = scalar_lea.vmem %s1348_s29, 1536 }
  0x7c   : > { %390 = vadd.xlane.f32.xlu0 %v1676_v3  ;;  %412 = vadd.xlane.f32.xlu1 %v406_v2  ;;  %v1104_v20 = vpack.c.bf16 %v497_v19, %v496_v18  ;;  %v1108_v23 = vpack.c.bf16 %v499_v22, %v498_v21  ;;  %v500_v24 = vld [vmem:[#allocation5 + $0x40] sm:$0xff]  ;;  %v501_v25 = vld [vmem:[#allocation5 + $0x48] sm:$0xff]  ;;  %v502_v27 = vld [vmem:[#allocation5 + $0x50] sm:$0xff]  ;;  %p1344_p11 = scmp.ne.s32.totalorder %s1761_s15, %s1343_s28  ;;  %p1350_p7 = scmp.lt.s32.totalorder %s1761_s15, %s1348_s29 }
  0x7d   : > { %1099 = vmatpush3.bf16.msra.mxu0 %v1096_v6  ;;  %v1112_v26 = vpack.c.bf16 %v501_v25, %v500_v24  ;;  %v503_v28 = vld [vmem:[#allocation5 + $0x58] sm:$0xff]  ;;  %v504_v30 = vld [vmem:[#allocation5 + $0x60] sm:$0xff]  ;;  %v505_v31 = vld [vmem:[#allocation5 + $0x68] sm:$0xff]  ;;  %p1351_p9 = scmp.lt.s32.totalorder %s1349_s24, %s1343_s28 }
  0x7e   : > { %1101 = vmatprep.subr.bf16.mxu0 %v1100_v15  ;;  %v1116_v29 = vpack.c.bf16 %v503_v28, %v502_v27  ;;  %v1120_v32 = vpack.c.bf16 %v505_v31, %v504_v30  ;;  %v506_v33 = vld [vmem:[#allocation5 + $0x70] sm:$0xff]  ;;  %v507_v34 = vld [vmem:[#allocation5 + $0x78] sm:$0xff]  ;;  %v959_v18 = vld [vmem:[%s1811_s1] ss:$0 sm:$0xff]  ;;  %p1345_p2 = pnand %p1344_p11, %p1843_p0 }
  0x7f   : > { %v1124_v35 = vpack.c.bf16 %v507_v34, %v506_v33  ;;  %v960_v22 = vld [vmem:[%s1812_s2] ss:$0 sm:$0xff]  ;;  %p1352_p12 = por %p1351_p9, %p1350_p7 }
  0x80   : > { %392 = vadd.xlane.f32.xlu0 %v1681_v8  ;;  %414 = vadd.xlane.f32.xlu1 %v407_v7  ;;  %p1346_p3 = pneg %p1345_p2 }
  0x81   : > { %1103 = vmatpush3.bf16.msra.mxu0 %v1100_v15 }
  0x82   : > { %1105 = vmatprep.subr.bf16.mxu0 %v1104_v20  ;;  %p1353_p1 = pnand %p1352_p12, %p1346_p3 }
  0x84   : > { %416 = vadd.xlane.f32.xlu0 %v408_v9  ;;  %418 = vadd.xlane.f32.xlu1 %v409_v10 }
  0x85   : > { %1107 = vmatpush3.bf16.msra.mxu0 %v1104_v20 }
  0x86   : > { %1109 = vmatprep.subr.bf16.mxu0 %v1108_v23 }
  0x88   : > { %396 = vadd.xlane.f32.xlu0 %v1688_v11  ;;  %398 = vadd.xlane.f32.xlu1 %v1690_v12 }
  0x89   : > { %1111 = vmatpush3.bf16.msra.mxu0 %v1108_v23 }
  0x8a   : > { %1113 = vmatprep.subr.bf16.mxu0 %v1112_v26 }
  0x8c   : > { %420 = vadd.xlane.f32.xlu0 %v410_v16  ;;  %422 = vadd.xlane.f32.xlu1 %v411_v17 }
  0x8d   : > { %1115 = vmatpush3.bf16.msra.mxu0 %v1112_v26 }
  0x8e   : > { %1117 = vmatprep.subr.bf16.mxu0 %v1116_v29 }
  0x91   : > { %1119 = vmatpush3.bf16.msra.mxu0 %v1116_v29 }
  0x92   : > { %1121 = vmatprep.subr.bf16.mxu0 %v1120_v32 }
  0x95   : > { %1123 = vmatpush3.bf16.msra.mxu0 %v1120_v32 }
  0x96   : > { %1125 = vmatprep.subr.bf16.mxu0 %v1124_v35 }
  0x99   : > { %1127 = vmatpush3.bf16.msra.mxu0 %v1124_v35 }
 0x105   : > { %v395_v36 = vpop.xlane.xlu1 %394  ;;  %v389_v37 = vpop.xlane.xlu0 %388 }
 0x106   : > { %v400_v38 = vmul.f32 0.03125, %v389_v37  ;;  %v403_v48 = vmul.f32 0.03125, %v395_v36 }
 0x108   : > { %v436_v39 = vmul.f32 %v400_v38, %v400_v38  ;;  %v439_v56 = vmul.f32 %v403_v48, %v403_v48  ;;  %v430_v9 = vsub.f32 %v1670_v1, %v400_v38  ;;  %v433_v32 = vsub.f32 %v1668_v0, %v403_v48  ;;  %v720_v48 = vld [vmem:[#allocation7] sm:$0xff] }
 0x109   : > { %v391_v40 = vpop.xlane.xlu0 %390  ;;  %v413_v41 = vpop.xlane.xlu1 %412 }
 0x10a   : > { %v401_v42 = vmul.f32 0.03125, %v391_v40  ;;  %v424_v43 = vmul.f32 0.03125, %v413_v41 }
 0x10c   : > { %v437_v44 = vmul.f32 %v401_v42, %v401_v42  ;;  %v442_v45 = vsub.f32 %v424_v43, %v436_v39  ;;  %v431_v1 = vsub.f32 %v1676_v3, %v401_v42 }
 0x10d   : > { %v393_v46 = vpop.xlane.xlu0 %392  ;;  %v415_v47 = vpop.xlane.xlu1 %414 }
 0x10e   : > { %v448_v49 = vadd.f32 1e-05, %v442_v45  ;;  %v402_v50 = vmul.f32 0.03125, %v393_v46  ;;  %v425_v51 = vmul.f32 0.03125, %v415_v47 }
 0x110   : > { %1233 = vrsqrt.f32 %v448_v49  ;;  %v438_v52 = vmul.f32 %v402_v50, %v402_v50  ;;  %v443_v53 = vsub.f32 %v425_v51, %v437_v44  ;;  %v432_v29 = vsub.f32 %v1681_v8, %v402_v50  ;;  %v721_v49 = vld [vmem:[#allocation7 + $0x8] sm:$0xff] }
 0x111   : > { %v417_v54 = vpop.xlane.xlu0 %416  ;;  %v419_v55 = vpop.xlane.xlu1 %418  ;;  %v1128_v50 = vpack.c.bf16 %v721_v49, %v720_v48 }
 0x112   : > { %v449_v57 = vadd.f32 1e-05, %v443_v53  ;;  %v426_v58 = vmul.f32 0.03125, %v417_v54  ;;  %v427_v59 = vmul.f32 0.03125, %v419_v55 }
 0x113   : > { %1129 = vmatprep.subr.bf16.mxu1 %v1128_v50 }
 0x114   : > { %1235 = vrsqrt.f32 %v449_v57  ;;  %v444_v60 = vsub.f32 %v426_v58, %v438_v52  ;;  %v445_v61 = vsub.f32 %v427_v59, %v439_v56  ;;  %1131 = vmatpush3.bf16.msra.mxu1 %v1128_v50 }
 0x115   : > { %v397_v62 = vpop.xlane.xlu0 %396  ;;  %v399_v63 = vpop.xlane.xlu1 %398 }
 0x116   : > { %v450_v2 = vadd.f32 1e-05, %v444_v60  ;;  %v451_v4 = vadd.f32 1e-05, %v445_v61  ;;  %v404_v5 = vmul.f32 0.03125, %v397_v62  ;;  %v405_v6 = vmul.f32 0.03125, %v399_v63 }
 0x118   : > { %1237 = vrsqrt.f32 %v450_v2  ;;  %v440_v7 = vmul.f32 %v404_v5, %v404_v5  ;;  %v441_v10 = vmul.f32 %v405_v6, %v405_v6  ;;  %v434_v40 = vsub.f32 %v1688_v11, %v404_v5  ;;  %v961_v11 = vld [vmem:[%s1814_s4] ss:$0 sm:$0xff] }
 0x119   : > { %1239 = vrsqrt.f32 %v451_v4  ;;  %v421_v13 = vpop.xlane.xlu0 %420  ;;  %v423_v14 = vpop.xlane.xlu1 %422  ;;  %v435_v8 = vsub.f32 %v1690_v12, %v405_v6 }
 0x11a   : > { %v1234_v15 = vpop.eup %1233  ;;  %v428_v16 = vmul.f32 0.03125, %v421_v13  ;;  %v429_v17 = vmul.f32 0.03125, %v423_v14  ;;  %v723_v13 = vld [vmem:[#allocation7 + $0x18] sm:$0xff] }
 0x11b   : > { %v460_v19 = vmul.f32 %v1234_v15, %v430_v9 }
 0x11c   : > { %v446_v20 = vsub.f32 %v428_v16, %v440_v7  ;;  %v447_v21 = vsub.f32 %v429_v17, %v441_v10  ;;  %v722_v10 = vld [vmem:[#allocation7 + $0x10] sm:$0xff]  ;;  %v724_v17 = vld [vmem:[#allocation7 + $0x20] sm:$0xff] }
 0x11d   : > { %v473_v23 = vmul.f32 %v959_v18, %v460_v19  ;;  %v1132_v15 = vpack.c.bf16 %v723_v13, %v722_v10 }
 0x11e   : > { %v1236_v24 = vpop.eup %1235  ;;  %v452_v25 = vadd.f32 1e-05, %v446_v20  ;;  %v453_v26 = vadd.f32 1e-05, %v447_v21 }
 0x11f   : > { %v486_v27 = vadd.f32 %v960_v22, %v473_v23  ;;  %v461_v28 = vmul.f32 %v1236_v24, %v431_v1  ;;  %1133 = vmatprep.subr.bf16.mxu1 %v1132_v15  ;;  %v727_v1 = vld [vmem:[#allocation7 + $0x38] sm:$0xff]  ;;  %v728_v24 = vld [vmem:[#allocation7 + $0x40] sm:$0xff] }
 0x120   : > { %1241 = vrsqrt.f32 %v452_v25  ;;  %1135 = vmatpush3.bf16.msra.mxu1 %v1132_v15  ;;  %v729_v25 = vld [vmem:[#allocation7 + $0x48] sm:$0xff] }
 0x121   : > { %1243 = vrsqrt.f32 %v453_v26  ;;  %1046 = vmatprep.mubr.f32.mxu0 %v486_v27  ;;  %v474_v30 = vmul.f32 %v959_v18, %v461_v28  ;;  %v1144_v26 = vpack.c.bf16 %v729_v25, %v728_v24  ;;  %v730_v27 = vld [vmem:[#allocation7 + $0x50] sm:$0xff]  ;;  %v731_v28 = vld [vmem:[#allocation7 + $0x58] sm:$0xff] }
 0x122   : > { %v1238_v31 = vpop.eup %1237 }
 0x123   : > { %v1240_v33 = vpop.eup %1239  ;;  %v487_v34 = vadd.f32 %v960_v22, %v474_v30  ;;  %v462_v35 = vmul.f32 %v1238_v31, %v432_v29  ;;  %v1148_v29 = vpack.c.bf16 %v731_v28, %v730_v27  ;;  %v732_v30 = vld [vmem:[#allocation7 + $0x60] sm:$0xff]  ;;  %v733_v31 = vld [vmem:[#allocation7 + $0x68] sm:$0xff] }
 0x124   : > { %v463_v36 = vmul.f32 %v1240_v33, %v433_v32  ;;  %v1152_v32 = vpack.c.bf16 %v733_v31, %v732_v30  ;;  %v734_v33 = vld [vmem:[#allocation7 + $0x70] sm:$0xff] }
 0x125   : > { %1047 = vmatmul.mubr.f32.vlgmr.msra.gmra.mrb[0].mxu0 %v487_v34  ;;  %v475_v3 = vmul.f32 %v959_v18, %v462_v35  ;;  %v735_v34 = vld [vmem:[#allocation7 + $0x78] sm:$0xff] }
 0x126   : > { %v476_v37 = vmul.f32 %v959_v18, %v463_v36  ;;  %v1156_v35 = vpack.c.bf16 %v735_v34, %v734_v33 }
 0x127   : > { %v488_v38 = vadd.f32 %v960_v22, %v475_v3 }
 0x128   : > { %v489_v39 = vadd.f32 %v960_v22, %v476_v37 }
 0x129   : > { %1049 = vmatprep.mubr.f32.mxu0 %v488_v38 }
 0x12a   : > { %v1242_v41 = vpop.eup %1241  ;;  %1050 = vmatmul.mubr.f32.gmra.mrb[2].mxu0 %v489_v39 }
 0x12b   : > { %v1244_v42 = vpop.eup %1243  ;;  %v464_v43 = vmul.f32 %v1242_v41, %v434_v40 }
 0x12c   : > { %v465_v44 = vmul.f32 %v1244_v42, %v435_v8 }
 0x12d   : > { %v477_v0 = vmul.f32 %v959_v18, %v464_v43 }
 0x12e   : > { %v478_v45 = vmul.f32 %v959_v18, %v465_v44  ;;  %v725_v18 = vld [vmem:[#allocation7 + $0x28] sm:$0xff] }
 0x12f   : > { %v490_v46 = vadd.f32 %v960_v22, %v477_v0  ;;  %v1136_v20 = vpack.c.bf16 %v725_v18, %v724_v17  ;;  %v962_v18 = vld [vmem:[%s1815_s5] ss:$0 sm:$0xff] }
 0x130   : > { %v491_v47 = vadd.f32 %v960_v22, %v478_v45  ;;  %v726_v22 = vld [vmem:[#allocation7 + $0x30] sm:$0xff] }
 0x131   : > { %1052 = vmatprep.mubr.f32.mxu0 %v490_v46  ;;  %1137 = vmatprep.subr.bf16.mxu1 %v1136_v20  ;;  %v1140_v23 = vpack.c.bf16 %v727_v1, %v726_v22 }
 0x132   : > { %1053 = vmatmul.mubr.f32.gmra.mrb[4].mxu0 %v491_v47  ;;  %1139 = vmatpush3.bf16.msra.mxu1 %v1136_v20 }
 0x133   : > { %1141 = vmatprep.subr.bf16.mxu1 %v1140_v23 }
 0x136   : > { %1143 = vmatpush3.bf16.msra.mxu1 %v1140_v23 }
 0x137   : > { %1145 = vmatprep.subr.bf16.mxu1 %v1144_v26 }
 0x13a   : > { %1147 = vmatpush3.bf16.msra.mxu1 %v1144_v26 }
 0x13b   : > { %1149 = vmatprep.subr.bf16.mxu1 %v1148_v29 }
 0x13e   : > { %1151 = vmatpush3.bf16.msra.mxu1 %v1148_v29 }
 0x13f   : > { %1153 = vmatprep.subr.bf16.mxu1 %v1152_v32 }
 0x142   : > { %1155 = vmatpush3.bf16.msra.mxu1 %v1152_v32 }
 0x143   : > { %1157 = vmatprep.subr.bf16.mxu1 %v1156_v35 }
 0x146   : > { %1159 = vmatpush3.bf16.msra.mxu1 %v1156_v35 }
 0x1f8   : > { %v1048_v12 = vpop.f32.mrb[0].mxu0 }
 0x1f9   : > { %v587_v51 = vadd.f32 %v1048_v12, %v961_v11  ;;  %v581_v52 = vpop.f32.mrb[1].mxu0 }
 0x1fa   : > { %v582_v53 = vadd.f32 %v961_v11, %v581_v52 }
 0x1fb   : > { %v1713_v54 = vmax.f32 %v587_v51, 0.0 }
 0x1fc   : > { %v1715_v55 = vmax.f32 %v582_v53, 0.0 }
 0x1fd   : > { %618 = vadd.xlane.f32.xlu1 %v1713_v54  ;;  %v1051_v56 = vpop.f32.mrb[2].mxu0  ;;  %v635_v59 = vmul.f32 %v1713_v54, %v1713_v54 }
 0x1fe   : > { %616 = vadd.xlane.f32.xlu0 %v1715_v55  ;;  %v591_v57 = vpop.f32.mrb[3].mxu0  ;;  %v597_v58 = vadd.f32 %v1051_v56, %v961_v11  ;;  %v634_v61 = vmul.f32 %v1715_v55, %v1715_v55 }
 0x1ff   : > { %v592_v60 = vadd.f32 %v961_v11, %v591_v57 }
 0x200   : > { %v1723_v62 = vmax.f32 %v597_v58, 0.0 }
 0x201   : > { %642 = vadd.xlane.f32.xlu1 %v635_v59  ;;  %v1725_v63 = vmax.f32 %v592_v60, 0.0 }
 0x202   : > { %640 = vadd.xlane.f32.xlu0 %v634_v61  ;;  %v637_v6 = vmul.f32 %v1723_v62, %v1723_v62 }
 0x203   : > { %v636_v9 = vmul.f32 %v1725_v63, %v1725_v63 }
 0x205   : > { %622 = vadd.xlane.f32.xlu1 %v1723_v62  ;;  %v1054_v2 = vpop.f32.mrb[4].mxu0 }
 0x206   : > { %620 = vadd.xlane.f32.xlu0 %v1725_v63  ;;  %v601_v4 = vpop.f32.mrb[5].mxu0  ;;  %v607_v5 = vadd.f32 %v1054_v2, %v961_v11 }
 0x207   : > { %v602_v7 = vadd.f32 %v961_v11, %v601_v4 }
 0x208   : > { %v1733_v14 = vmax.f32 %v607_v5, 0.0 }
 0x209   : > { %646 = vadd.xlane.f32.xlu1 %v637_v6  ;;  %v1735_v16 = vmax.f32 %v602_v7, 0.0 }
 0x20a   : > { %644 = vadd.xlane.f32.xlu0 %v636_v9  ;;  %v639_v19 = vmul.f32 %v1733_v14, %v1733_v14 }
 0x20b   : > { %v638_v21 = vmul.f32 %v1735_v16, %v1735_v16 }
 0x20d   : > { %626 = vadd.xlane.f32.xlu1 %v1733_v14 }
 0x20e   : > { %624 = vadd.xlane.f32.xlu0 %v1735_v16 }
 0x211   : > { %650 = vadd.xlane.f32.xlu1 %v639_v19 }
 0x212   : > { %648 = vadd.xlane.f32.xlu0 %v638_v21 }
 0x28a   : > { %v619_v36 = vpop.xlane.xlu1 %618 }
 0x28b   : > { %v629_v3 = vmul.f32 0.03125, %v619_v36  ;;  %v617_v37 = vpop.xlane.xlu0 %616 }
 0x28c   : > { %v628_v38 = vmul.f32 0.03125, %v617_v37 }
 0x28d   : > { %v665_v40 = vmul.f32 %v629_v3, %v629_v3  ;;  %v659_v6 = vsub.f32 %v1713_v54, %v629_v3  ;;  %v963_v54 = vld [vmem:[%s1816_s6] ss:$0 sm:$0xff] }
 0x28e   : > { %v643_v39 = vpop.xlane.xlu1 %642  ;;  %v664_v42 = vmul.f32 %v628_v38, %v628_v38  ;;  %v658_v10 = vsub.f32 %v1715_v55, %v628_v38 }
 0x28f   : > { %v653_v41 = vmul.f32 0.03125, %v643_v39  ;;  %v641_v8 = vpop.xlane.xlu0 %640 }
 0x290   : > { %v652_v43 = vmul.f32 0.03125, %v641_v8 }
 0x291   : > { %v671_v44 = vsub.f32 %v653_v41, %v665_v40 }
 0x292   : > { %v670_v0 = vsub.f32 %v652_v43, %v664_v42  ;;  %v623_v45 = vpop.xlane.xlu1 %622 }
 0x293   : > { %v677_v46 = vadd.f32 1e-05, %v671_v44  ;;  %v631_v47 = vmul.f32 0.03125, %v623_v45  ;;  %v621_v48 = vpop.xlane.xlu0 %620 }
 0x294   : > { %v676_v49 = vadd.f32 1e-05, %v670_v0  ;;  %v630_v50 = vmul.f32 0.03125, %v621_v48 }
 0x295   : > { %1245 = vrsqrt.f32 %v677_v46  ;;  %v667_v12 = vmul.f32 %v631_v47, %v631_v47  ;;  %v661_v29 = vsub.f32 %v1723_v62, %v631_v47 }
 0x296   : > { %1247 = vrsqrt.f32 %v676_v49  ;;  %v647_v11 = vpop.xlane.xlu1 %646  ;;  %v666_v53 = vmul.f32 %v630_v50, %v630_v50  ;;  %v660_v32 = vsub.f32 %v1725_v63, %v630_v50 }
 0x297   : > { %v655_v51 = vmul.f32 0.03125, %v647_v11  ;;  %v645_v52 = vpop.xlane.xlu0 %644 }
 0x298   : > { %v654_v56 = vmul.f32 0.03125, %v645_v52 }
 0x299   : > { %v673_v57 = vsub.f32 %v655_v51, %v667_v12 }
 0x29a   : > { %v672_v58 = vsub.f32 %v654_v56, %v666_v53  ;;  %v627_v59 = vpop.xlane.xlu1 %626 }
 0x29b   : > { %v679_v60 = vadd.f32 1e-05, %v673_v57  ;;  %v633_v61 = vmul.f32 0.03125, %v627_v59  ;;  %v625_v2 = vpop.xlane.xlu0 %624 }
 0x29c   : > { %v678_v4 = vadd.f32 1e-05, %v672_v58  ;;  %v632_v5 = vmul.f32 0.03125, %v625_v2 }
 0x29d   : > { %1249 = vrsqrt.f32 %v679_v60  ;;  %v669_v13 = vmul.f32 %v633_v61, %v633_v61  ;;  %v663_v38 = vsub.f32 %v1733_v14, %v633_v61  ;;  %v964_v14 = vld [vmem:[%s1818_s8] ss:$0 sm:$0xff] }
 0x29e   : > { %1251 = vrsqrt.f32 %v678_v4  ;;  %v651_v7 = vpop.xlane.xlu1 %650  ;;  %v668_v20 = vmul.f32 %v632_v5, %v632_v5  ;;  %v662_v41 = vsub.f32 %v1735_v16, %v632_v5 }
 0x29f   : > { %v1246_v9 = vpop.eup %1245  ;;  %v657_v15 = vmul.f32 0.03125, %v651_v7  ;;  %v649_v17 = vpop.xlane.xlu0 %648 }
 0x2a0   : > { %v1248_v19 = vpop.eup %1247  ;;  %v656_v21 = vmul.f32 0.03125, %v649_v17  ;;  %v689_v22 = vmul.f32 %v1246_v9, %v659_v6 }
 0x2a1   : > { %v675_v1 = vsub.f32 %v657_v15, %v669_v13  ;;  %v688_v23 = vmul.f32 %v1248_v19, %v658_v10 }
 0x2a2   : > { %v674_v24 = vsub.f32 %v656_v21, %v668_v20  ;;  %v702_v25 = vmul.f32 %v962_v18, %v689_v22 }
 0x2a3   : > { %v681_v55 = vadd.f32 1e-05, %v675_v1  ;;  %v701_v26 = vmul.f32 %v962_v18, %v688_v23 }
 0x2a4   : > { %v680_v27 = vadd.f32 1e-05, %v674_v24  ;;  %v715_v30 = vadd.f32 %v963_v54, %v702_v25 }
 0x2a5   : > { %1253 = vrsqrt.f32 %v681_v55  ;;  %v714_v28 = vadd.f32 %v963_v54, %v701_v26 }
 0x2a6   : > { %1255 = vrsqrt.f32 %v680_v27 }
 0x2a7   : > { %v1250_v31 = vpop.eup %1249  ;;  %1087 = vmatprep.mubr.f32.mxu1 %v714_v28 }
 0x2a8   : > { %v1252_v33 = vpop.eup %1251  ;;  %1088 = vmatmul.mubr.f32.vlgmr.msra.gmra.mrb[0].mxu1 %v715_v30  ;;  %v691_v34 = vmul.f32 %v1250_v31, %v661_v29 }
 0x2a9   : > { %v690_v35 = vmul.f32 %v1252_v33, %v660_v32 }
 0x2aa   : > { %v704_v36 = vmul.f32 %v962_v18, %v691_v34 }
 0x2ab   : > { %v703_v3 = vmul.f32 %v962_v18, %v690_v35 }
 0x2ac   : > { %v717_v39 = vadd.f32 %v963_v54, %v704_v36 }
 0x2ad   : > { %v716_v37 = vadd.f32 %v963_v54, %v703_v3 }
 0x2af   : > { %v1254_v40 = vpop.eup %1253  ;;  %1090 = vmatprep.mubr.f32.mxu1 %v716_v37 }
 0x2b0   : > { %v1256_v62 = vpop.eup %1255  ;;  %1091 = vmatmul.mubr.f32.gmra.mrb[2].mxu1 %v717_v39  ;;  %v693_v8 = vmul.f32 %v1254_v40, %v663_v38 }
 0x2b1   : > { %v692_v63 = vmul.f32 %v1256_v62, %v662_v41 }
 0x2b2   : > { %v706_v42 = vmul.f32 %v962_v18, %v693_v8 }
 0x2b3   : > { %v705_v43 = vmul.f32 %v962_v18, %v692_v63 }
 0x2b4   : > { %v719_v0 = vadd.f32 %v963_v54, %v706_v42 }
 0x2b5   : > { %v718_v44 = vadd.f32 %v963_v54, %v705_v43 }
 0x2b7   : > { %1093 = vmatprep.mubr.f32.mxu1 %v718_v44 }
 0x2b8   : > { %1094 = vmatmul.mubr.f32.gmra.mrb[4].mxu1 %v719_v0 }
 0x37b   : > { %v1089_v45 = vpop.f32.mrb[0].mxu1 }
 0x37c   : > { %v815_v46 = vadd.f32 %v1089_v45, %v964_v14  ;;  %v809_v16 = vpop.f32.mrb[1].mxu1 }
 0x37d   : > { %v810_v47 = vadd.f32 %v964_v14, %v809_v16 }
 0x37e   : > { %839 = vst [vmem:[%s379_s14 + $0x8] sm:$0xff] %v815_v46 }
 0x37f   : > { %838 = vst [vmem:[%s379_s14] sm:$0xff] %v810_v47 }
 0x383   : > { %v1092_v48 = vpop.f32.mrb[2].mxu1 }
 0x384   : > { %v825_v49 = vadd.f32 %v1092_v48, %v964_v14  ;;  %v819_v50 = vpop.f32.mrb[3].mxu1 }
 0x385   : > { %v820_v11 = vadd.f32 %v964_v14, %v819_v50 }
 0x386   : > { %841 = vst [vmem:[%s379_s14 + $0x18] sm:$0xff] %v825_v49 }
 0x387   : > { %840 = vst [vmem:[%s379_s14 + $0x10] sm:$0xff] %v820_v11 }
 0x38b   : > { %v1095_v12 = vpop.f32.mrb[4].mxu1 }
 0x38c   : > { %v835_v51 = vadd.f32 %v1095_v12, %v964_v14  ;;  %v829_v52 = vpop.f32.mrb[5].mxu1 }
 0x38d   : > { %v830_v53 = vadd.f32 %v964_v14, %v829_v52 }
 0x38e   : > { %843 = vst [vmem:[%s379_s14 + $0x28] sm:$0xff] %v835_v51 }
 0x38f   : > { %842 = vst [vmem:[%s379_s14 + $0x20] sm:$0xff] %v830_v53 }
 0x390   : > { %1356 = shalt.err (!%p1353_p1)
}
 0x391   : > { %s1357_s3 = scalar_lea.hbm %s1766_s23, 768  ;;  %s1361_s16 = scalar_lea.hbm %s1819_s9, 1536 }
 0x392   : > { %p1358_p13 = scmp.ne.s32.totalorder %s1766_s23, %s1357_s3  ;;  %p1362_p4 = scmp.lt.u32.totalorder %s1766_s23, %s1819_s9 }
 0x393   : > { %p1363_p5 = scmp.lt.u32.totalorder %s1361_s16, %s1357_s3  ;;  %p1365_p11 = scmp.lt.u32.totalorder %s1357_s3, %s1766_s23 }
 0x394   : > { %p1359_p6 = pnand %p1358_p13, %p1843_p0 }
 0x395   : > { %p1364_p8 = por %p1363_p5, %p1362_p4 }
 0x396   : > { %p1360_p10 = pneg %p1359_p6 }
 0x397   : > { %p1366_p2 = por %p1365_p11, %p1364_p8 }
 0x399   : > { %p1367_p3 = pnand %p1366_p2, %p1360_p10 }
 0x39b   : > { %1370 = shalt.err (!%p1367_p3)
}
 0x39c   : > { %s1421_s19 = smov 128   ;;  %s1422_s18 = smov 8  }
 0x39d   : > { %1172 = dma.vmem_to_hbm [thread:$0]  (%p1843_p0), %s1761_s15, 768, %s1766_s23, %s845_s25, %s1421_s19, %s1421_s19, %s1422_s18  }
 0x39e PF: > { %s1844_s28 = sld [smem:[#allocation12_spill]]  ;;  %s873_s13 = sand.u32 1, %s1401_s30  }
 0x39f   : > { %p1846_p9 = scmp.ge.s32.totalorder %s1413_s12, 2  ;;  %s874_s29 = scalar_lea.sflag [#allocation4], %s873_s13 }
 0x3a4   : > { %p1845_p7 = scmp.ne.s32.totalorder %s1844_s28, 0 }
 0x3a6   : > { %p1186_p12 = pnand %p1846_p9, %p1845_p7 }
 0x3a8   : > { %1396 = dma.done.wait (!%p1186_p12), %s874_s29, 768  }
 0x3a9   : > { %1398 = vsyncadd (!%p1186_p12), %s874_s29, 4294966528  ;;  %p23_p1 = scmp.ge.s32.totalorder %s1589_s20, 4   ;;  %s1847_s30 = smov %s1405_s10 }
 0x3aa   : > { %s1848_s10 = smov %s1409_s11  ;;  %s1849_s11 = smov %s1605_s27 }
 0x3ab   : > { %s1850_s12 = smov %s1589_s20  ;;  %25 = sbr.rel (!%p23_p1) target bundleno = 9 (0x9), region = 109 }
 0x3b2   :  { %879 = vsyncpa [#allocation3], 1 }
 0x3b3   :  { %881 = vsyncpa [#allocation3 + $0x1], 1 }
 0x3b4   :  { %882 = vsyncpa [#allocation6], 1 }
 0x3b5   :  { %883 = vsyncpa [#allocation4], 1 }
 0x3b6   :  { %885 = vsyncpa [#allocation4 + $0x1], 1 }

</bundles_post_ra>
